<compile_context>
chip_gen: v5e
topology: v5e:2x2
jax: 0.10.0
libtpu: 0.0.40
codegen_flags: <defaults>
</compile_context>

<pallas_src>
import math

import jax
import jax.numpy as jnp
from jax.experimental import pallas as pl
from jax.experimental.pallas import tpu as pltpu


def _round_up(x, m):
    return (x + m - 1) // m * m


# ----------------------------- Pallas kernel ------------------------------- #
def _patch_embed_kernel(x_ref, w_ref, b_ref, o_ref):
    # x_ref : (tm, K)   bf16 patch pixels for tm patches
    # w_ref : (K, tn)   bf16 flattened conv weight slice (already transposed)
    # b_ref : (1, tn)   f32 conv bias slice
    # o_ref : (tm, tn)  patch embeddings
    acc = jnp.dot(x_ref[...], w_ref[...], preferred_element_type=jnp.float32)
    o_ref[...] = (acc + b_ref[...]).astype(o_ref.dtype)


def patch_embed_matmul(patches, w, b, *, tm=256, tn=512, out_dtype=jnp.float32):
    """patches: (M, K), w: (K, N), b: (N,) -> (M, N) in out_dtype.

    N must already be a multiple of 128 (padded by the caller). M is padded to
    the row tile here and the padding rows are sliced off on return.
    """
    M, K = patches.shape
    K2, N = w.shape
    assert K == K2 and b.shape == (N,)
    assert N % 128 == 0, "pad hidden dim to a multiple of 128 in the caller"

    # Clamp the row tile to the problem size (keep sublane alignment of 8).
    tm = min(tm, _round_up(M, 8))
    # Shrink tn to a 128-aligned divisor of N (tn=128 always terminates the loop).
    tn = min(tn, N)
    while N % tn != 0:
        tn -= 128

    Mp = _round_up(M, tm)
    if Mp != M:
        patches = jnp.pad(patches, ((0, Mp - M), (0, 0)))

    b2d = b.reshape(1, N).astype(jnp.float32)
    out_itemsize = jnp.dtype(out_dtype).itemsize

    cost = pl.CostEstimate(
        flops=2 * Mp * N * K,
        transcendentals=0,
        bytes_accessed=(
            Mp * K * patches.dtype.itemsize
            + K * N * w.dtype.itemsize
            + Mp * N * out_itemsize
        ),
    )

    out = pl.pallas_call(
        _patch_embed_kernel,
        out_shape=jax.ShapeDtypeStruct((Mp, N), out_dtype),
        grid_spec=pltpu.PrefetchScalarGridSpec(
            num_scalar_prefetch=0,
            grid=(Mp // tm, N // tn),
            in_specs=[
                pl.BlockSpec((tm, K), lambda i, j: (i, 0)),
                pl.BlockSpec((K, tn), lambda i, j: (0, j)),
                pl.BlockSpec((1, tn), lambda i, j: (0, j)),
            ],
            out_specs=pl.BlockSpec((tm, tn), lambda i, j: (i, j)),
        ),
        compiler_params=pltpu.CompilerParams(
            dimension_semantics=("parallel", "parallel"),
            vmem_limit_bytes=32 * 1024 * 1024,
        ),
        cost_estimate=cost,
    )(patches, w, b2d)

    return out[:M] if Mp != M else out


# ------------------------------ Module wrapper ------------------------------ #
class CustomViTPatchEmbeddingsPallas:
    def __init__(self, patch_size, max_h, max_w, num_channels, hidden_size, key,
                 *, compute_dtype=jnp.bfloat16, out_dtype=jnp.float32,
                 tm=256, tn=512):
        ph = pw = patch_size
        self.patch_size = (ph, pw)
        self.num_channels = num_channels
        self.hidden_size = hidden_size
        # Matches the reference module (ceil on max sizes; forward floors on the
        # actual image size via the conv stride).
        self.num_patches = math.ceil(max_h / ph) * math.ceil(max_w / pw)
        self.compute_dtype = compute_dtype
        self.out_dtype = out_dtype
        self.tm = tm
        self.tn = tn

        k_w, k_b = jax.random.split(key)
        # Conv2d-style init: weight (hidden, C, ph, pw), bias (hidden,), f32 master.
        fan_in = num_channels * ph * pw
        bound = 1.0 / math.sqrt(fan_in)
        self.weight = jax.random.uniform(
            k_w, (hidden_size, num_channels, ph, pw), jnp.float32, -bound, bound
        )
        self.bias = jax.random.uniform(
            k_b, (hidden_size,), jnp.float32, -bound, bound
        )

        # Flatten weight to (K, N) with K ordered as (c, i, j) — the PyTorch
        # Conv2d contraction order — then pad N to a multiple of 128 for
        # lane-dense stores, and cast to the bf16 compute dtype for the MXU.
        self.n_padded = _round_up(hidden_size, 128)
        w_flat = self.weight.reshape(hidden_size, fan_in).T          # (K, N)
        self.w_flat = jnp.pad(
            w_flat, ((0, 0), (0, self.n_padded - hidden_size))
        ).astype(compute_dtype)                                      # (K, Np) bf16
        self.bias_padded = jnp.pad(
            self.bias, (0, self.n_padded - hidden_size)
        ).astype(jnp.float32)                                        # (Np,) f32

    def __call__(self, pixel_values):
        # pixel_values: (B, C, H, W) — NCHW, same as the PyTorch module.
        B, C, H, W = pixel_values.shape
        if C != self.num_channels:
            raise ValueError(
                "Make sure that the channel dimension of the pixel values match "
                "with the one set in the configuration."
            )
        ph, pw = self.patch_size
        Hp, Wp = H // ph, W // pw

        # Cast first so the im2col pass moves bf16 bytes (the cast fuses into it).
        x = pixel_values.astype(self.compute_dtype)
        x = x.reshape(B, C, Hp, ph, Wp, pw)
        x = x.transpose(0, 2, 4, 1, 3, 5)               # (B, Hp, Wp, C, ph, pw)
        patches = x.reshape(B * Hp * Wp, C * ph * pw)   # (M, K)
        # TODO(synk): fold patch extraction into the kernel's input DMA
        # (allow_input_fusion / in-kernel gather) to remove this extra HBM pass.

        out = patch_embed_matmul(
            patches, self.w_flat, self.bias_padded,
            tm=self.tm, tn=self.tn, out_dtype=self.out_dtype,
        )                                               # (M, Np)
        out = out[:, : self.hidden_size]                # drop N padding
        return out.reshape(B, Hp * Wp, self.hidden_size)


# ---------------------------------- Demo ------------------------------------ #
if __name__ == "__main__":
    key = jax.random.PRNGKey(0)
    k_param, k_x = jax.random.split(key)

    # Small config: patch=4, image 16x16, 4 channels, hidden 32 -> 16 patches.
    B, C, H, W = 2, 4, 16, 16
    patch, hidden = 4, 32

    module = CustomViTPatchEmbeddingsPallas(
        patch_size=patch, max_h=H, max_w=W,
        num_channels=C, hidden_size=hidden, key=k_param,
    )

    pixel_values = jax.random.normal(k_x, (B, C, H, W), jnp.float32)

    embeddings = module(pixel_values)
    jax.block_until_ready(embeddings)

    assert embeddings.shape == (B, (H // patch) * (W // patch), hidden)

    # Reference im2col in plain JAX.
    xf = pixel_values.reshape(B, C, H // patch, patch, W // patch, patch)
    xf = xf.transpose(0, 2, 4, 1, 3, 5).reshape(B * (H // patch) * (W // patch), -1)

    # (1) Same-precision reference: bf16 operands, f32 accumulation -> tight match.
    w_bf = module.w_flat[:, :hidden].astype(jnp.float32)
    ref_bf16 = (xf.astype(jnp.bfloat16).astype(jnp.float32) @ w_bf
                + module.bias).reshape(B, -1, hidden)
    assert jnp.allclose(embeddings, ref_bf16, atol=1e-3, rtol=1e-3)

    # (2) Full-f32 reference (module semantics): loose tol for bf16 operand rounding.
    ref_f32 = (xf @ module.weight.reshape(hidden, -1).T
               + module.bias).reshape(B, -1, hidden)
    assert jnp.allclose(embeddings, ref_f32, atol=3e-2, rtol=3e-2)

    print("KERNEL_OK")
</pallas_src>

<mosaic_0001>
module attributes {stable_mosaic.version = 11 : i64} {
  func.func @_patch_embed_kernel(%arg0: i32, %arg1: i32, %arg2: memref<32x64xbf16, #tpu.memory_space<vmem>>, %arg3: memref<64x128xbf16, #tpu.memory_space<vmem>>, %arg4: memref<1x128xf32, #tpu.memory_space<vmem>>, %arg5: memref<32x128xf32, #tpu.memory_space<vmem>>) attributes {dimension_semantics = [#tpu.dimension_semantics<parallel>, #tpu.dimension_semantics<parallel>], iteration_bounds = array<i64: 1, 1>, scalar_prefetch = 0 : i64, scratch_operands = 0 : i64, tpu.core_type = #tpu.core_type<tc>, window_params = [{transform_indices = @transform_0, window_bounds = array<i64: 32, 64>}, {transform_indices = @transform_1, window_bounds = array<i64: 64, 128>}, {transform_indices = @transform_2, window_bounds = array<i64: 1, 128>}, {transform_indices = @transform_3, window_bounds = array<i64: 32, 128>}]} {
    %c0 = arith.constant 0 : index
    %c0_0 = arith.constant 0 : index
    %0 = vector.load %arg2[%c0, %c0_0] : memref<32x64xbf16, #tpu.memory_space<vmem>>, vector<32x64xbf16>
    %c0_1 = arith.constant 0 : index
    %c0_2 = arith.constant 0 : index
    %1 = vector.load %arg3[%c0_1, %c0_2] : memref<64x128xbf16, #tpu.memory_space<vmem>>, vector<64x128xbf16>
    %cst = arith.constant dense<0.000000e+00> : vector<32x128xf32>
    %2 = tpu.matmul %0, %1, %cst {dimension_numbers = #tpu.dot_dimension_numbers<[1], [0], [0], [1], [0, 0, 1, 1], [], []>} : vector<32x64xbf16>, vector<64x128xbf16>, vector<32x128xf32> -> vector<32x128xf32>
    %c0_3 = arith.constant 0 : index
    %c0_4 = arith.constant 0 : index
    %3 = vector.load %arg4[%c0_3, %c0_4] : memref<1x128xf32, #tpu.memory_space<vmem>>, vector<1x128xf32>
    %4 = vector.broadcast %3 : vector<1x128xf32> to vector<32x128xf32>
    %5 = arith.addf %2, %4 : vector<32x128xf32>
    %c0_5 = arith.constant 0 : index
    %c0_6 = arith.constant 0 : index
    %6 = vector.load %arg5[%c0_5, %c0_6] : memref<32x128xf32, #tpu.memory_space<vmem>>, vector<32x128xf32>
    tpu.vector_store %arg5[%c0_5, %c0_6], %5 {strides = array<i32>} : memref<32x128xf32, #tpu.memory_space<vmem>>, vector<32x128xf32>,
    return
  }
  func.func @transform_0(%arg0: i32, %arg1: i32) -> (i32, i32) {
    %c0_i32 = arith.constant 0 : i32
    %c0_i32_0 = arith.constant 0 : i32
    return %arg0, %c0_i32 : i32, i32
  }
  func.func @transform_1(%arg0: i32, %arg1: i32) -> (i32, i32) {
    %c0_i32 = arith.constant 0 : i32
    %c0_i32_0 = arith.constant 0 : i32
    return %c0_i32, %arg1 : i32, i32
  }
  func.func @transform_2(%arg0: i32, %arg1: i32) -> (i32, i32) {
    %c0_i32 = arith.constant 0 : i32
    %c0_i32_0 = arith.constant 0 : i32
    return %c0_i32, %arg1 : i32, i32
  }
  func.func @transform_3(%arg0: i32, %arg1: i32) -> (i32, i32) {
    %c0_i32 = arith.constant 0 : i32
    return %arg0, %arg1 : i32, i32
  }
}

</mosaic_0001>

<bundles_post_ra>
// kernel: tpu_custom_call.1
= control target key start
LH: loop header
LB: loop body
LE: loop exit
PB: predicated region body
PF: predicated region fallthrough
CT: control target
= control target key end

     0   :  { %8 = vsyncpa [#allocation3], 0  ;;  %s309_s0 = inlined_call_operand.hbm [shape: bf16[32,64], index: 0, kind: input, shape index: {}]   ;;  %s310_s1 = inlined_call_operand.hbm [shape: bf16[64,128], index: 1, kind: input, shape index: {}]   ;;  %s311_s2 = inlined_call_operand.vmem [shape: f32[1,128], index: 2, kind: input, shape index: {}]   ;;  %s312_s3 = inlined_call_operand.hbm [shape: f32[32,128], index: 3, kind: output, shape index: {}]  }
   0x1   :  { %9 = vsyncpa [#allocation6], 0 }
   0x2   :  { %10 = vsyncpa [#allocation4], 0  ;;  %s15_s14 = sshll.u32 %s309_s0, 4  ;;  %s270_s15 = smov [#allocation2]   ;;  %s16_s14 = int_to_ptr.hbm [resolvable:$true] %s15_s14 }
   0x3   :  { %s17_s16 = sshll.u32 %s270_s15, 4  ;;  %s28_s19 = sshll.u32 %s310_s1, 4  ;;  %s18_s16 = int_to_ptr.vmem [resolvable:$true] %s17_s16  ;;  %s29_s19 = int_to_ptr.hbm [resolvable:$true] %s28_s19 }
   0x4   :  { %s271_s20 = smov 64   ;;  %s272_s21 = smov 4  }
   0x5   :  { %23 = dma.hbm_to_vmem [thread:$0]  %s16_s14, 256, %s18_s16, [#allocation3], %s271_s20, %s271_s20, %s272_s21  }
   0x6   :  { %s273_s22 = smov [#allocation5]  }
   0x7   :  { %s30_s23 = sshll.u32 %s273_s22, 4  ;;  %s31_s23 = int_to_ptr.vmem [resolvable:$true] %s30_s23 }
   0x8   :  { %36 = dma.hbm_to_vmem [thread:$0]  %s29_s19, 512, %s31_s23, [#allocation6], %s271_s20, %s271_s20, %s272_s21  }
   0x9   :  { %264 = dma.done.wait [#allocation3], 256  }
   0xa   :  { %265 = vsyncadd [#allocation3], 4294967040 }
   0xb   :  { %266 = dma.done.wait [#allocation6], 512  }
   0xc   :  { %267 = vsyncadd [#allocation6], 4294966784  ;;  %v179_v0 = vld [vmem:[#allocation5 + $0x18] sm:$0xff]  ;;  %v178_v1 = vld [vmem:[#allocation5 + $0x10] sm:$0xff]  ;;  %vm98_vm0 = vcmask 523264   ;;  %s274_s24 = smov [#allocation7]  }
   0xd   :  { %109 = vmatpush.bf16.msra.mxu0 %v179_v0  ;;  %180 = vmatpush.bf16.msra.mxu1 %v179_v0  ;;  %v177_v2 = vld [vmem:[#allocation5 + $0x8] sm:$0xff]  ;;  %v176_v3 = vld [vmem:[#allocation5] sm:$0xff]  ;;  %v174_v4 = vld [vmem:[#allocation2] sm:$0xff]  ;;  %s132_s25 = sshll.u32 %s274_s24, 4  ;;  %s134_s28 = sshll.u32 %s312_s3, 4  ;;  %s133_s25 = int_to_ptr.vmem [resolvable:$true] %s132_s25  ;;  %s135_s28 = int_to_ptr.hbm [resolvable:$true] %s134_s28 }
   0xe   :  { %v175_v5 = vld [vmem:[#allocation2 + $0x8] sm:$0xff]  ;;  %v191_v6 = vld [vmem:[%s311_s2] ss:$0 sm:$0xff]  ;;  %s275_s2 = smov 128   ;;  %s276_s29 = smov 8  }
  0x11   :  { %110 = vmatpush.bf16.msra.mxu0 %v178_v1  ;;  %181 = vmatpush.bf16.msra.mxu1 %v178_v1 }
  0x15   :  { %111 = vmatpush.bf16.msra.mxu0 %v177_v2  ;;  %182 = vmatpush.bf16.msra.mxu1 %v177_v2 }
  0x19   :  { %112 = vmatpush.bf16.msra.mxu0 %v176_v3  ;;  %183 = vmatpush.bf16.msra.mxu1 %v176_v3 }
  0x1c   :  { %172 = vmatmul.msk.bf16.vlgmr.msra.gmra.mxu0 %vm98_vm0, %v174_v4  ;;  %173 = vmatmul.msk.bf16.vlgmr.msra.gmra.mxu1 %vm98_vm0, %v175_v5 }
  0x99   :  { %v114_v7 = vpop.f32.mrf.mxu0  ;;  %v119_v8 = vpop.f32.mrf.mxu1 }
  0x9a   :  { %v115_v9 = vadd.f32 %v191_v6, %v114_v7  ;;  %v120_v10 = vadd.f32 %v191_v6, %v119_v8 }
  0x9c   :  { %124 = vst [vmem:[#allocation7] sm:$0xff] %v115_v9 }
  0x9d   :  { %126 = vst [vmem:[#allocation7 + $0x10] sm:$0xff] %v120_v10 }
  0xa1   :  { %v116_v11 = vpop.f32.mrf.mxu0  ;;  %v121_v12 = vpop.f32.mrf.mxu1 }
  0xa2   :  { %v117_v13 = vadd.f32 %v191_v6, %v116_v11  ;;  %v122_v14 = vadd.f32 %v191_v6, %v121_v12 }
  0xa4   :  { %125 = vst [vmem:[#allocation7 + $0x8] sm:$0xff] %v117_v13 }
  0xa5   :  { %127 = vst [vmem:[#allocation7 + $0x18] sm:$0xff] %v122_v14 }
  0xa6   :  { %140 = dma.vmem_to_hbm [thread:$0]  %s133_s25, 512, %s135_s28, [#allocation4], %s275_s2, %s275_s2, %s276_s29  }
  0xa7   :  { %268 = dma.done.wait [#allocation4], 512  }
  0xa8   :  { %269 = vsyncadd [#allocation4], 4294966784 }
  0xa9   :  { %145 = vsyncpa [#allocation3], 1 }
  0xaa   :  { %146 = vsyncpa [#allocation6], 1 }
  0xab   :  { %147 = vsyncpa [#allocation4], 1 }

</bundles_post_ra>
